<compile_context>
chip_gen: v6e
topology: v6e:2x2x1
jax: 0.10.0
libtpu: 0.0.40
codegen_flags: <defaults>
</compile_context>

<pallas_src>
import jax
import jax.numpy as jnp
from jax.experimental import pallas as pl
from jax.experimental.pallas import tpu as pltpu

_LANES = 128


def _copy_kernel(x_ref, o_ref):
    # Single whole-array VMEM tile; one lane-dense copy.
    o_ref[...] = x_ref[...]


@jax.jit
def text_only_forward(text_x, audio_x, video_x):
    """Pallas equivalent of textOnly.forward: returns text_x unchanged.

    audio_x / video_x are accepted for signature parity but unused, exactly as
    in the reference PyTorch module.  NOTE: the fastest possible implementation
    is `return text_x` (no kernel); the pallas_call below is kept only because
    a kernel boundary is required, and is made as cheap as possible.
    """
    del audio_x, video_x  # unused, matching the reference module
    seq_len, batch, text_in = text_x.shape
    total = seq_len * batch * text_in

    # Sublane-dense presentation: pad (if needed) to a multiple of 128 lanes
    # and reshape to (rows, 128).  For the toy shape this is (4, 128): the 512
    # f32 values pack into a single vreg's lanes/sublanes instead of spreading
    # one sublane across 4 vregs as the old (1, 512) layout did.  The reshape
    # happens outside the kernel under jit and is pure layout plumbing.
    pad = (-total) % _LANES
    flat = text_x.reshape(total)
    if pad:
        flat = jnp.pad(flat, (0, pad))
    rows = (total + pad) // _LANES
    flat2d = flat.reshape(rows, _LANES)

    out2d = pl.pallas_call(
        _copy_kernel,
        out_shape=jax.ShapeDtypeStruct((rows, _LANES), text_x.dtype),
        # No grid: one block covering the whole (tiny) array -> a single DMA
        # in and a single DMA out, no per-step pipeline overhead.
        in_specs=[pl.BlockSpec(memory_space=pltpu.MemorySpace.VMEM)],
        out_specs=pl.BlockSpec(memory_space=pltpu.MemorySpace.VMEM),
        # Advisory: this custom call is essentially free (pure small copy).
        cost_estimate=pl.CostEstimate(
            flops=0,
            transcendentals=0,
            bytes_accessed=2 * rows * _LANES * text_x.dtype.itemsize,
        ),
    )(flat2d)

    return out2d.reshape(-1)[:total].reshape(seq_len, batch, text_in)


if __name__ == "__main__":
    # args.input_features = (text_in, video_in, audio_in)
    text_in, video_in, audio_in = 32, 16, 8
    seq_len, batch = 8, 2

    key = jax.random.PRNGKey(0)
    k_t, k_a, k_v = jax.random.split(key, 3)
    text_x = jax.random.normal(k_t, (seq_len, batch, text_in), dtype=jnp.float32)
    audio_x = jax.random.normal(k_a, (seq_len, batch, audio_in), dtype=jnp.float32)
    video_x = jax.random.normal(k_v, (seq_len, batch, video_in), dtype=jnp.float32)

    out = text_only_forward(text_x, audio_x, video_x)
    out = jax.block_until_ready(out)

    # Correctness check against the (trivial) reference semantics.
    assert out.shape == text_x.shape and out.dtype == text_x.dtype
    assert bool(jnp.array_equal(out, text_x))

    print("KERNEL_OK")
</pallas_src>

<mosaic_0001>
module attributes {stable_mosaic.version = 11 : i64} {
  func.func @_copy_kernel(%arg0: memref<4x128xf32, #tpu.memory_space<vmem>>, %arg1: memref<4x128xf32, #tpu.memory_space<vmem>>) attributes {dimension_semantics = [], scalar_prefetch = 0 : i64, scratch_operands = 0 : i64, tpu.core_type = #tpu.core_type<tc>} {
    %c0 = arith.constant 0 : index
    %c0_0 = arith.constant 0 : index
    %0 = vector.load %arg0[%c0, %c0_0] : memref<4x128xf32, #tpu.memory_space<vmem>>, vector<4x128xf32>
    %c0_1 = arith.constant 0 : index
    %c0_2 = arith.constant 0 : index
    %1 = vector.load %arg1[%c0_1, %c0_2] : memref<4x128xf32, #tpu.memory_space<vmem>>, vector<4x128xf32>
    tpu.vector_store %arg1[%c0_1, %c0_2], %0 {strides = array<i32>} : memref<4x128xf32, #tpu.memory_space<vmem>>, vector<4x128xf32>,
    return
  }
}

</mosaic_0001>

<bundles_post_ra>
// kernel: text_only_forward.1
= control target key start
LH: loop header
LB: loop body
LE: loop exit
PB: predicated region body
PF: predicated region fallthrough
CT: control target
= control target key end

     0   :  { %s30_s0 = inlined_call_operand.vmem [shape: f32[4,128], index: 0, kind: input, shape index: {}]   ;;  %s31_s1 = inlined_call_operand.vmem [shape: f32[4,128], index: 1, kind: output, shape index: {}]  }
   0x1   :  { %v8_v0 = vld [vmem:[%s30_s0] sm:$0xf] }
   0x2   :  { %9 = vst [vmem:[%s31_s1] sm:$0xf] %v8_v0 }

</bundles_post_ra>
